<compile_context>
chip_gen: v7x
topology: tpu7x:2x2x1
jax: 0.10.0
libtpu: 0.0.40
codegen_flags: <defaults>
</compile_context>

<pallas_src>
import functools

import jax
import jax.numpy as jnp
from jax.experimental import pallas as pl
from jax.experimental.pallas import tpu as pltpu

HIDDEN = 64          # nn.Linear(size_input, 64)
HIDDEN_PAD = 128     # lane-dense padded hidden width (intermediate only, stays on-chip)


def _round_up(n, m):
    return ((n + m - 1) // m) * m


def dynamics_kernel(x_ref, w1_ref, b1_ref, w3_ref, b3_ref, y_ref):
    # x_ref : (TB, K)            f32 batch tile (cast to bf16 for the MXU here)
    # w1_ref: (K, HIDDEN_PAD)    bf16, resident
    # b1_ref: (1, HIDDEN_PAD)    f32,  resident
    # w3_ref: (HIDDEN_PAD, NO)   bf16, resident
    # b3_ref: (1, NO)            f32,  resident
    # y_ref : (TB, NO)           f32
    x = x_ref[...].astype(jnp.bfloat16)
    h = jnp.dot(x, w1_ref[...], preferred_element_type=jnp.float32)
    h = jnp.maximum(h + b1_ref[...], 0.0)                       # f32 epilogue
    y = jnp.dot(h.astype(jnp.bfloat16), w3_ref[...],
                preferred_element_type=jnp.float32)
    y_ref[...] = y + b3_ref[...]


@functools.partial(jax.jit, static_argnames=("size_input", "size_output", "block_batch"))
def dynamics_forward(x, params, *, size_input, size_output, block_batch=1024):
    """Pallas forward of Dynamics.  Returns (y, None, None) like the module."""
    x = jnp.asarray(x, jnp.float32)
    if x.ndim == 1:
        x = x[None, :]
    B, K = x.shape
    assert K == size_input

    w1, b1, w3, b3 = params["w1"], params["b1"], params["w3"], params["b3"]
    assert w1.shape == (K, HIDDEN_PAD) and w1.dtype == jnp.bfloat16
    assert w3.shape == (HIDDEN_PAD, size_output) and w3.dtype == jnp.bfloat16
    NO = size_output

    # Batch tile: multiple of 8 sublanes; ensure >= 2 grid steps when the batch
    # permits so v7x megacore has work on both TensorCores.
    TB = _round_up(min(block_batch, B), 8)
    if B >= 16 and pl.cdiv(B, TB) < 2:
        TB = _round_up(pl.cdiv(B, 2), 8)
    B_pad = _round_up(B, TB)
    if B_pad != B:  # only pad when TB does not divide B (no-op for the common case)
        x = jnp.pad(x, ((0, B_pad - B), (0, 0)))
    grid = (B_pad // TB,)

    cost = pl.CostEstimate(
        flops=2 * B_pad * (K * HIDDEN_PAD + HIDDEN_PAD * NO),
        transcendentals=0,
        bytes_accessed=(4 * B_pad * K                      # x (f32)
                        + 2 * K * HIDDEN_PAD               # w1 (bf16)
                        + 4 * HIDDEN_PAD                   # b1 (f32)
                        + 2 * HIDDEN_PAD * NO              # w3 (bf16)
                        + 4 * NO                           # b3 (f32)
                        + 4 * B_pad * NO),                 # y (f32)
    )

    y_pad = pl.pallas_call(
        dynamics_kernel,
        out_shape=jax.ShapeDtypeStruct((B_pad, NO), jnp.float32),
        grid_spec=pltpu.PrefetchScalarGridSpec(
            num_scalar_prefetch=0,
            grid=grid,
            in_specs=[
                pl.BlockSpec((TB, K), lambda i: (i, 0)),          # x: streamed tiles
                pl.BlockSpec((K, HIDDEN_PAD), lambda i: (0, 0)),  # weights: resident
                pl.BlockSpec((1, HIDDEN_PAD), lambda i: (0, 0)),
                pl.BlockSpec((HIDDEN_PAD, NO), lambda i: (0, 0)),
                pl.BlockSpec((1, NO), lambda i: (0, 0)),
            ],
            out_specs=pl.BlockSpec((TB, NO), lambda i: (i, 0)),   # narrow, unpadded out
        ),
        compiler_params=pltpu.CompilerParams(
            dimension_semantics=("parallel",),   # megacore sharding on v7x
            vmem_limit_bytes=32 << 20,           # safe within v7x's 64 MiB VMEM
        ),
        cost_estimate=cost,
    )(x, w1, b1, w3, b3)

    y = y_pad if B_pad == B else y_pad[:B]       # cheap: (B_pad, NO) is narrow
    return (y, None, None)


def init_params(key, size_input, size_output):
    """nn.Linear-style init U(-1/sqrt(fan_in), 1/sqrt(fan_in)).
    Weights stored transposed: (in, out). Biases stored as (1, out). f32, unpadded."""
    def linear(k, fan_in, fan_out):
        kw, kb = jax.random.split(k)
        bound = 1.0 / jnp.sqrt(fan_in)
        w = jax.random.uniform(kw, (fan_in, fan_out), jnp.float32, -bound, bound)
        b = jax.random.uniform(kb, (1, fan_out), jnp.float32, -bound, bound)
        return w, b

    k1, k3 = jax.random.split(key)
    p = {}
    p["w1"], p["b1"] = linear(k1, size_input, HIDDEN)
    # affine2 exists in the module but is unused in forward(); not materialized.
    p["w3"], p["b3"] = linear(k3, HIDDEN, size_output)
    return p


def prepare_params(raw, size_input, size_output):
    """One-time (outside the jitted forward): pad hidden dim to 128 lanes and
    cast weights to bf16 for the MXU; biases stay f32 for the f32 epilogue."""
    w1 = jnp.zeros((size_input, HIDDEN_PAD), jnp.float32).at[:, :HIDDEN].set(raw["w1"])
    b1 = jnp.zeros((1, HIDDEN_PAD), jnp.float32).at[:, :HIDDEN].set(raw["b1"])
    w3 = jnp.zeros((HIDDEN_PAD, size_output), jnp.float32).at[:HIDDEN, :].set(raw["w3"])
    b3 = raw["b3"].astype(jnp.float32).reshape(1, size_output)
    return {
        "w1": w1.astype(jnp.bfloat16),
        "b1": b1,
        "w3": w3.astype(jnp.bfloat16),
        "b3": b3,
    }


def reference_forward(x, raw):
    if x.ndim == 1:
        x = x[None, :]
    h = jnp.maximum(x @ raw["w1"] + raw["b1"], 0.0)
    return h @ raw["w3"] + raw["b3"]


if __name__ == "__main__":
    size_input = 8
    size_output = 4
    batch = 2

    key = jax.random.PRNGKey(0)
    k_param, k_x = jax.random.split(key)
    raw_params = init_params(k_param, size_input, size_output)
    params = prepare_params(raw_params, size_input, size_output)
    x = jax.random.normal(k_x, (batch, size_input), jnp.float32)

    y, none_a, none_b = dynamics_forward(
        x, params, size_input=size_input, size_output=size_output
    )
    y = jax.block_until_ready(y)

    y_ref = reference_forward(x, raw_params)
    assert none_a is None and none_b is None
    assert y.shape == (batch, size_output)
    # bf16 MXU inputs => slightly looser tolerance vs the f32 reference.
    assert jnp.allclose(y, y_ref, atol=2e-2, rtol=2e-2)

    print("KERNEL_OK")
</pallas_src>

<mosaic_0001>
module attributes {stable_mosaic.version = 11 : i64} {
  func.func @dynamics_kernel(%arg0: i32, %arg1: memref<8x8xf32, #tpu.memory_space<vmem>>, %arg2: memref<8x128xbf16, #tpu.memory_space<vmem>>, %arg3: memref<1x128xf32, #tpu.memory_space<vmem>>, %arg4: memref<128x4xbf16, #tpu.memory_space<vmem>>, %arg5: memref<1x4xf32, #tpu.memory_space<vmem>>, %arg6: memref<8x4xf32, #tpu.memory_space<vmem>>) attributes {dimension_semantics = [#tpu.dimension_semantics<parallel>], iteration_bounds = array<i64: 1>, scalar_prefetch = 0 : i64, scratch_operands = 0 : i64, tpu.core_type = #tpu.core_type<tc>, window_params = [{transform_indices = @transform_0, window_bounds = array<i64: 8, 8>}, {pipeline_mode = #tpu.pipeline_mode<synchronous>, transform_indices = @transform_1, window_bounds = array<i64: 8, 128>}, {pipeline_mode = #tpu.pipeline_mode<synchronous>, transform_indices = @transform_2, window_bounds = array<i64: 1, 128>}, {pipeline_mode = #tpu.pipeline_mode<synchronous>, transform_indices = @transform_3, window_bounds = array<i64: 128, 4>}, {pipeline_mode = #tpu.pipeline_mode<synchronous>, transform_indices = @transform_4, window_bounds = array<i64: 1, 4>}, {transform_indices = @transform_5, window_bounds = array<i64: 8, 4>}]} {
    %c0 = arith.constant 0 : index
    %c0_0 = arith.constant 0 : index
    %0 = vector.load %arg1[%c0, %c0_0] : memref<8x8xf32, #tpu.memory_space<vmem>>, vector<8x8xf32>
    %1 = arith.truncf %0 : vector<8x8xf32> to vector<8x8xbf16>
    %c0_1 = arith.constant 0 : index
    %c0_2 = arith.constant 0 : index
    %2 = vector.load %arg2[%c0_1, %c0_2] : memref<8x128xbf16, #tpu.memory_space<vmem>>, vector<8x128xbf16>
    %cst = arith.constant dense<0.000000e+00> : vector<8x128xf32>
    %3 = tpu.matmul %1, %2, %cst {dimension_numbers = #tpu.dot_dimension_numbers<[1], [0], [0], [1], [0, 0, 1, 1], [], []>} : vector<8x8xbf16>, vector<8x128xbf16>, vector<8x128xf32> -> vector<8x128xf32>
    %c0_3 = arith.constant 0 : index
    %c0_4 = arith.constant 0 : index
    %4 = vector.load %arg3[%c0_3, %c0_4] : memref<1x128xf32, #tpu.memory_space<vmem>>, vector<1x128xf32>
    %5 = vector.broadcast %4 : vector<1x128xf32> to vector<8x128xf32>
    %6 = arith.addf %3, %5 : vector<8x128xf32>
    %cst_5 = arith.constant 0.000000e+00 : f32
    %7 = vector.broadcast %cst_5 : f32 to vector<8x128xf32>
    %8 = arith.maximumf %6, %7 : vector<8x128xf32>
    %9 = arith.truncf %8 : vector<8x128xf32> to vector<8x128xbf16>
    %c0_6 = arith.constant 0 : index
    %c0_7 = arith.constant 0 : index
    %10 = vector.load %arg4[%c0_6, %c0_7] : memref<128x4xbf16, #tpu.memory_space<vmem>>, vector<128x4xbf16>
    %cst_8 = arith.constant dense<0.000000e+00> : vector<8x4xf32>
    %11 = tpu.matmul %9, %10, %cst_8 {dimension_numbers = #tpu.dot_dimension_numbers<[1], [0], [0], [1], [0, 0, 1, 1], [], []>} : vector<8x128xbf16>, vector<128x4xbf16>, vector<8x4xf32> -> vector<8x4xf32>
    %c0_9 = arith.constant 0 : index
    %c0_10 = arith.constant 0 : index
    %12 = vector.load %arg5[%c0_9, %c0_10] : memref<1x4xf32, #tpu.memory_space<vmem>>, vector<1x4xf32>
    %13 = vector.broadcast %12 : vector<1x4xf32> to vector<8x4xf32>
    %14 = arith.addf %11, %13 : vector<8x4xf32>
    %c0_11 = arith.constant 0 : index
    %c0_12 = arith.constant 0 : index
    %15 = vector.load %arg6[%c0_11, %c0_12] : memref<8x4xf32, #tpu.memory_space<vmem>>, vector<8x4xf32>
    tpu.vector_store %arg6[%c0_11, %c0_12], %14 {strides = array<i32>} : memref<8x4xf32, #tpu.memory_space<vmem>>, vector<8x4xf32>,
    return
  }
  func.func @transform_0(%arg0: i32) -> (i32, i32) {
    %c0_i32 = arith.constant 0 : i32
    %c0_i32_0 = arith.constant 0 : i32
    return %arg0, %c0_i32 : i32, i32
  }
  func.func @transform_1(%arg0: i32) -> (i32, i32) {
    %c0_i32 = arith.constant 0 : i32
    %c0_i32_0 = arith.constant 0 : i32
    %c0_i32_1 = arith.constant 0 : i32
    return %c0_i32, %c0_i32_0 : i32, i32
  }
  func.func @transform_2(%arg0: i32) -> (i32, i32) {
    %c0_i32 = arith.constant 0 : i32
    %c0_i32_0 = arith.constant 0 : i32
    %c0_i32_1 = arith.constant 0 : i32
    return %c0_i32, %c0_i32_0 : i32, i32
  }
  func.func @transform_3(%arg0: i32) -> (i32, i32) {
    %c0_i32 = arith.constant 0 : i32
    %c0_i32_0 = arith.constant 0 : i32
    %c0_i32_1 = arith.constant 0 : i32
    return %c0_i32, %c0_i32_0 : i32, i32
  }
  func.func @transform_4(%arg0: i32) -> (i32, i32) {
    %c0_i32 = arith.constant 0 : i32
    %c0_i32_0 = arith.constant 0 : i32
    %c0_i32_1 = arith.constant 0 : i32
    return %c0_i32, %c0_i32_0 : i32, i32
  }
  func.func @transform_5(%arg0: i32) -> (i32, i32) {
    %c0_i32 = arith.constant 0 : i32
    %c0_i32_0 = arith.constant 0 : i32
    return %arg0, %c0_i32 : i32, i32
  }
}

</mosaic_0001>

<bundles_post_ra>
// kernel: dynamics_forward.1
= control target key start
LH: loop header
LB: loop body
LE: loop exit
PB: predicated region body
PF: predicated region fallthrough
CT: control target
= control target key end

     0   :  { %vm35_vm0 = vcmask 1043456   ;;  %v256_v0 = vmov 0.0   ;;  %vm257_vm1 = vmmov 0   ;;  %vm31_vm2 = vcmask 64512   ;;  %s327_s1 = inlined_call_operand.vmem [shape: bf16[8,128], index: 1, kind: input, shape index: {}]   ;;  %s328_s0 = inlined_call_operand.vmem [shape: f32[8,8], index: 0, kind: input, shape index: {}]   ;;  %s329_s3 = inlined_call_operand.vmem [shape: bf16[128,4], index: 3, kind: input, shape index: {}]   ;;  %s330_s2 = inlined_call_operand.vmem [shape: f32[1,128], index: 2, kind: input, shape index: {}]   ;;  %s331_s4 = inlined_call_operand.vmem [shape: f32[1,4], index: 4, kind: input, shape index: {}]   ;;  %s332_s5 = inlined_call_operand.vmem [shape: f32[8,4], index: 5, kind: output, shape index: {}]  }
   0x1   :  { %220 = vmatprep.subr.bf16.mxu0 %v256_v0  ;;  %v23_v1 = vld [vmem:[%s327_s1] sm:$0xf]  ;;  %222 = vmatprep.mubr.msk.bf16.mxu0 %vm257_vm1, %v256_v0  ;;  %v249_v6 = vld [vmem:[%s329_s3 + $0x8] sm:$0xff]   ;;  %v250_v7 = vld [vmem:[%s329_s3 + $0x10] sm:$0xff]   ;;  %vm192_vm3 = vcmask 31744  }
   0x2   :  { %v21_v2 = vld [vmem:[%s328_s0] sm:$0xff]  ;;  %v37_v3 = vsel %vm35_vm0, %v23_v1, 0  ;;  %226 = vmatprep.subr.bf16.mxu1 %v256_v0  ;;  %242 = vmatprep.mubr.msk.bf16.mxu1 %vm257_vm1, %v256_v0  ;;  %v251_v8 = vld [vmem:[%s329_s3 + $0x18] sm:$0xff]   ;;  %v253_v10 = vld [vmem:[%s329_s3 + $0x28] sm:$0xff]  }
   0x3   :  { %v22_v4 = vpack.c.bf16 %v21_v2, %v21_v2  ;;  %v248_v5 = vld [vmem:[%s329_s3] sm:$0xff]   ;;  %221 = vmatpush3.bf16.msra.mxu0 %v37_v3  ;;  %v254_v11 = vld [vmem:[%s329_s3 + $0x30] sm:$0xff]   ;;  %v255_v12 = vld [vmem:[%s329_s3 + $0x38] sm:$0xff]  }
   0x4   :  { %227 = vmatpush3.bf16.msra.mxu1 %v248_v5  ;;  %v252_v9 = vld [vmem:[%s329_s3 + $0x20] sm:$0xff]  }
   0x5   :  { %228 = vmatprep.subr.bf16.mxu1 %v256_v0  ;;  %v198_v13 = vld [vmem:[%s330_s2] ss:$0 sm:$0xff] }
   0x6   :  { %223 = vmatmul.mubr.msk.bf16.vlgmr.msra.gmra.mrb[0].mxu0 %vm31_vm2, %v22_v4  ;;  %v200_v21 = vld [vmem:[%s331_s4] ss:$0 sm:$0xff] }
   0x8   :  { %229 = vmatpush3.bf16.msra.mxu1 %v249_v6 }
   0x9   :  { %230 = vmatprep.subr.bf16.mxu1 %v256_v0 }
   0xc   :  { %231 = vmatpush3.bf16.msra.mxu1 %v250_v7 }
   0xd   :  { %232 = vmatprep.subr.bf16.mxu1 %v256_v0 }
  0x10   :  { %233 = vmatpush3.bf16.msra.mxu1 %v251_v8 }
  0x11   :  { %234 = vmatprep.subr.bf16.mxu1 %v256_v0 }
  0x14   :  { %235 = vmatpush3.bf16.msra.mxu1 %v252_v9 }
  0x15   :  { %236 = vmatprep.subr.bf16.mxu1 %v256_v0 }
  0x18   :  { %237 = vmatpush3.bf16.msra.mxu1 %v253_v10 }
  0x19   :  { %238 = vmatprep.subr.bf16.mxu1 %v256_v0 }
  0x1c   :  { %239 = vmatpush3.bf16.msra.mxu1 %v254_v11 }
  0x1d   :  { %240 = vmatprep.subr.bf16.mxu1 %v256_v0 }
  0x20   :  { %241 = vmatpush3.bf16.msra.mxu1 %v255_v12 }
  0xd9   :  { %v73_v14 = vpop.f32.mrb[0].mxu0 }
  0xda   :  { %v74_v15 = vadd.f32 %v198_v13, %v73_v14  ;;  %v224_v16 = vpop.f32.mrb[1].mxu0 }
  0xdb   :  { %v76_v17 = vpop.f32.mrb[2].mxu0 }
  0xdc   :  { %v79_v18 = vmax.f32 %v74_v15, 0.0  ;;  %v225_v19 = vpop.f32.mrb[3].mxu0 }
  0xde   :  { %v80_v20 = vpack.c.bf16 %v79_v18, %v79_v18 }
  0xe0   :  { %243 = vmatmul.mubr.bf16.vlgmr.msra.gmra.mrb[0].mxu1 %v80_v20 }
 0x1b3   :  { %v186_v22 = vpop.f32.mrb[0].mxu1 }
 0x1b4   :  { %v187_v23 = vadd.f32 %v200_v21, %v186_v22  ;;  %v244_v24 = vpop.f32.mrb[1].mxu1 }
 0x1b5   :  { %v189_v25 = vpop.f32.mrb[2].mxu1 }
 0x1b6   :  { %193 = vst.msk [vmem:[%s332_s5] sm:$0xff] %vm192_vm3, %v187_v23  ;;  %v245_v26 = vpop.f32.mrb[3].mxu1 }

</bundles_post_ra>
